<compile_context>
chip_gen: v5e
topology: v5e:2x2
jax: 0.10.0
libtpu: 0.0.40
codegen_flags: <defaults>
</compile_context>

<pallas_src>
import jax
import jax.numpy as jnp
import numpy as np
from jax.experimental import pallas as pl
from jax.experimental.pallas import tpu as pltpu


def _cam_kernel(x_ref, o_ref):
    # x_ref block: (1, C, L) -- the whole flattened channel matrix for one batch.
    x = x_ref[0].astype(jnp.float32)                         # (C, L), lanes = L (dense)

    # energy[i, j] = sum_l x[i, l] * x[j, l]   (Q @ K^T, transpose fused into the dot)
    energy = jax.lax.dot_general(
        x, x, (((1,), (1,)), ((), ())),
        preferred_element_type=jnp.float32)                  # (C, C)

    # Row-wise numerically-stable softmax (dim=-1), matching torch.nn.Softmax(dim=-1).
    m = jnp.max(energy, axis=-1, keepdims=True)
    e = jnp.exp(energy - m)
    att = e / jnp.sum(e, axis=-1, keepdims=True)             # (C, C)

    out = jnp.dot(att, x, preferred_element_type=jnp.float32)  # (C, L)
    o_ref[0] = out.astype(o_ref.dtype)


def cam_forward(x):
    """CAM_Module.forward. x: (B, C, H, W, channle) -> same shape."""
    B, C, H, W, Ch = x.shape
    L = H * W * Ch
    xf = x.reshape(B, C, L)   # contiguous view, no HBM transpose

    # VMEM budget: in + out blocks, double-buffered, f32 working copy + slack.
    tile_bytes = C * L * 4
    vmem_need = 6 * tile_bytes + (2 << 20)
    if vmem_need > (32 << 20):
        # Cap at v7x physical VMEM (64 MiB); for larger shapes tile over L instead.
        compiler_params = pltpu.CompilerParams(
            dimension_semantics=("parallel",),
            vmem_limit_bytes=min(vmem_need, 64 << 20))
    else:
        compiler_params = pltpu.CompilerParams(
            dimension_semantics=("parallel",))

    out = pl.pallas_call(
        _cam_kernel,
        out_shape=jax.ShapeDtypeStruct((B, C, L), x.dtype),
        grid_spec=pltpu.PrefetchScalarGridSpec(
            num_scalar_prefetch=0,
            grid=(B,),
            in_specs=[pl.BlockSpec((1, C, L), lambda b: (b, 0, 0))],
            out_specs=pl.BlockSpec((1, C, L), lambda b: (b, 0, 0)),
        ),
        compiler_params=compiler_params,
    )(xf)

    return out.reshape(B, C, H, W, Ch)


# --------------------------- pure-JAX reference ---------------------------
def ref_forward(x):
    B, C, H, W, Ch = x.shape
    q = x.reshape(B, C, -1).astype(jnp.float32)                       # (B, C, L)
    energy = jnp.matmul(q, jnp.swapaxes(q, 1, 2),
                        precision=jax.lax.Precision.HIGHEST)          # (B, C, C)
    att = jax.nn.softmax(energy, axis=-1)
    out = jnp.matmul(att, q, precision=jax.lax.Precision.HIGHEST)     # (B, C, L)
    return out.reshape(B, C, H, W, Ch).astype(x.dtype)


if __name__ == "__main__":
    key = jax.random.PRNGKey(0)
    B, C, H, W, Ch = 2, 4, 16, 16, 8

    # Scale inputs so the softmax over the C x C energy matrix is non-degenerate
    # (pure N(0,1) inputs make the Gram matrix diagonal-dominant -> identity attention).
    x = 0.05 * jax.random.normal(key, (B, C, H, W, Ch), jnp.float32)

    out = jax.block_until_ready(cam_forward(x))
    ref = jax.block_until_ready(ref_forward(x))

    assert out.shape == (B, C, H, W, Ch)
    np.testing.assert_allclose(np.asarray(out), np.asarray(ref), rtol=1e-4, atol=1e-5)
    print("KERNEL_OK")
</pallas_src>

<mosaic_0001>
module attributes {stable_mosaic.version = 11 : i64} {
  func.func @_cam_kernel(%arg0: i32, %arg1: memref<1x4x2048xf32, #tpu.memory_space<vmem>>, %arg2: memref<1x4x2048xf32, #tpu.memory_space<vmem>>) attributes {dimension_semantics = [#tpu.dimension_semantics<parallel>], iteration_bounds = array<i64: 2>, scalar_prefetch = 0 : i64, scratch_operands = 0 : i64, tpu.core_type = #tpu.core_type<tc>, window_params = [{transform_indices = @transform_0, window_bounds = array<i64: 1, 4, 2048>}, {transform_indices = @transform_1, window_bounds = array<i64: 1, 4, 2048>}]} {
    %c0 = arith.constant 0 : index
    %c0_0 = arith.constant 0 : index
    %c0_1 = arith.constant 0 : index
    %0 = vector.load %arg1[%c0, %c0_0, %c0_1] : memref<1x4x2048xf32, #tpu.memory_space<vmem>>, vector<1x4x2048xf32>
    %1 = vector.shape_cast %0 : vector<1x4x2048xf32> to vector<4x2048xf32>
    %cst = arith.constant dense<0.000000e+00> : vector<4x4xf32>
    %2 = tpu.matmul %1, %1, %cst {dimension_numbers = #tpu.dot_dimension_numbers<[1], [1], [0], [0], [0, 0, 1, 0], [], []>} : vector<4x2048xf32>, vector<4x2048xf32>, vector<4x4xf32> -> vector<4x4xf32>
    %cst_2 = arith.constant dense<0xFF800000> : vector<4xf32>
    %3 = vector.multi_reduction <maximumf>, %2, %cst_2 [1] : vector<4x4xf32> to vector<4xf32>
    %4 = vector.shape_cast %3 : vector<4xf32> to vector<4x1xf32>
    %5 = vector.broadcast %4 : vector<4x1xf32> to vector<4x4xf32>
    %6 = arith.subf %2, %5 : vector<4x4xf32>
    %7 = math.exp %6 : vector<4x4xf32>
    %cst_3 = arith.constant dense<0.000000e+00> : vector<4xf32>
    %8 = vector.multi_reduction <add>, %7, %cst_3 [1] : vector<4x4xf32> to vector<4xf32>
    %9 = vector.shape_cast %8 : vector<4xf32> to vector<4x1xf32>
    %10 = vector.broadcast %9 : vector<4x1xf32> to vector<4x4xf32>
    %11 = arith.divf %7, %10 : vector<4x4xf32>
    %cst_4 = arith.constant dense<0.000000e+00> : vector<4x2048xf32>
    %12 = tpu.matmul %11, %1, %cst_4 {dimension_numbers = #tpu.dot_dimension_numbers<[1], [0], [0], [1], [0, 0, 1, 1], [], []>} : vector<4x4xf32>, vector<4x2048xf32>, vector<4x2048xf32> -> vector<4x2048xf32>
    %c0_5 = arith.constant 0 : index
    %c0_6 = arith.constant 0 : index
    %c0_7 = arith.constant 0 : index
    %13 = vector.load %arg2[%c0_5, %c0_6, %c0_7] : memref<1x4x2048xf32, #tpu.memory_space<vmem>>, vector<1x4x2048xf32>
    %14 = vector.shape_cast %13 : vector<1x4x2048xf32> to vector<4x2048xf32>
    %15 = vector.shape_cast %12 : vector<4x2048xf32> to vector<1x4x2048xf32>
    tpu.vector_store %arg2[%c0_5, %c0_6, %c0_7], %15 {strides = array<i32>} : memref<1x4x2048xf32, #tpu.memory_space<vmem>>, vector<1x4x2048xf32>,
    return
  }
  func.func @transform_0(%arg0: i32) -> (i32, i32, i32) {
    %c0_i32 = arith.constant 0 : i32
    %c0_i32_0 = arith.constant 0 : i32
    %c0_i32_1 = arith.constant 0 : i32
    return %arg0, %c0_i32, %c0_i32_0 : i32, i32, i32
  }
  func.func @transform_1(%arg0: i32) -> (i32, i32, i32) {
    %c0_i32 = arith.constant 0 : i32
    %c0_i32_0 = arith.constant 0 : i32
    %c0_i32_1 = arith.constant 0 : i32
    return %arg0, %c0_i32, %c0_i32_0 : i32, i32, i32
  }
}

</mosaic_0001>

<bundles_post_ra>
// kernel: tpu_custom_call.1
= control target key start
LH: loop header
LB: loop body
LE: loop exit
PB: predicated region body
PF: predicated region fallthrough
CT: control target
= control target key end

     0   :  { %6 = vsyncpa [#allocation3], 0  ;;  %s1529_s0 = inlined_call_operand.hbm [shape: f32[2,4,2048], index: 0, kind: input, shape index: {}]   ;;  %s1530_s1 = inlined_call_operand.hbm [shape: f32[2,4,2048], index: 1, kind: output, shape index: {}]  }
   0x1   :  { %8 = vsyncpa [#allocation3 + $0x1], 0 }
   0x2   :  { %9 = vsyncpa [#allocation4], 0 }
   0x3   :  { %11 = vsyncpa [#allocation4 + $0x1], 0  ;;  %s1307_s6 = smov 0   ;;  %s1309_s7 = smov 0  }
   0x4   :  { %s1311_s8 = smov 0   ;;  %s1313_s9 = smov 0  }
   0x5 LB: > { %s1328_s10 = sadd.s32 4294967295, %s1295_s9   ;;  %s1101_s11 = sadd.s32 4294967294, %s1295_s9   ;;  %s1295_s9 = sphi %s1313_s9, %s1540_s9   ;;  %s1291_s8 = sphi %s1311_s8, %s1539_s8   ;;  %s1287_s7 = sphi %s1309_s7, %s1538_s7   ;;  %s1283_s6 = sphi %s1307_s6, %s1537_s6  }
   0x6   : > { %s1332_s12 = sadd.s32 1, %s1295_s9   ;;  %s24_s13 = sadd.s32 1, %s1291_s8 }
   0x7   : > { %s21_s14 = ssub.s32 %s1295_s9, %s1332_s12  ;;  %p31_p0 = scmp.ne.s32.totalorder %s1291_s8, %s1287_s7 }
   0x8   : > { %p22_p1 = scmp.eq.s32.totalorder %s21_s14, 0  ;;  %p32_p2 = scmp.eq.s32.totalorder %s1295_s9, 0 }
   0x9   : > { %p37_p3 = scmp.ne.s32.totalorder %s1287_s7, %s1283_s6  ;;  %p38_p4 = scmp.eq.s32.totalorder %s1328_s10, 0 }
   0xa   : > { %s1344_s15 = scalar_select %p22_p1, %s1291_s8, %s24_s13  }
   0xb   : > { %p1346_p5 = por %p32_p2, %p31_p0  ;;  %p1350_p6 = por %p38_p4, %p37_p3 }
   0xc   : > { %p61_p7 = scmp.eq.s32.totalorder %s1328_s10, 1  ;;  %p67_p8 = scmp.eq.s32.totalorder %s1101_s11, 1 }
   0xd   : > { %p1161_p10 = scmp.lt.s32.totalorder %s1295_s9, 2  ;;  %s87_s20 = sand.u32 1, %s1291_s8  }
   0xe   : > { %p1357_p11 = por %p61_p7, %p31_p0  ;;  %p1361_p12 = por %p67_p8, %p37_p3 }
   0xf   : > { %s1147_s21 = sshll.u32 %s1295_s9, 6  ;;  %s1104_s22 = sshll.u32 %s87_s20, 6 }
  0x10   : > { %s96_s25 = scalar_lea.hbm %s1529_s0, %s1147_s21  ;;  %s91_s27 = scalar_lea.vmem [#allocation2], %s1104_s22 }
  0x11   : > { %s98_s26 = sshll.u32 %s96_s25, 4  ;;  %s100_s28 = sshll.u32 %s91_s27, 4  ;;  %s99_s26 = int_to_ptr.hbm [resolvable:$true] %s98_s26  ;;  %s101_s28 = int_to_ptr.vmem [resolvable:$true] %s100_s28 }
  0x12   : > { %p1372_p13 = pnand %p1161_p10, %p1346_p5  ;;  %p1107_p0 = scmp.ge.s32.totalorder %s1295_s9, 1 }
  0x13   : > { %p105_p1 = scmp.lt.s32.totalorder %s1295_s9, 3  ;;  %s88_s30 = scalar_lea.sflag [#allocation3], %s87_s20 }
  0x14   : > { %s1199_s2 = sshra.s32 %s99_s26, 4  ;;  %p1203_p3 = pneg %p1372_p13  ;;  %s1200_s2 = int_to_ptr.hbm [resolvable:$true] %s1199_s2 }
  0x15   : > { %s1201_s3 = scalar_lea.hbm %s1200_s2, 64  ;;  %s1206_s11 = scalar_lea.hbm %s1529_s0, 128 }
  0x16   : > { %p1202_p2 = scmp.ne.s32.totalorder %s1200_s2, %s1201_s3  ;;  %p1207_p5 = scmp.lt.s32.totalorder %s1200_s2, %s1529_s0 }
  0x17   : > { %p1208_p8 = scmp.lt.s32.totalorder %s1206_s11, %s1201_s3 }
  0x18   : > { %p1204_p4 = pnand %p1203_p3, %p1202_p2 }
  0x19   : > { %p1209_p10 = por %p1208_p8, %p1207_p5 }
  0x1a   : > { %p1205_p7 = pneg %p1204_p4 }
  0x1c   : > { %p1210_p9 = pnand %p1209_p10, %p1205_p7 }
  0x1e   : > { %1213 = shalt.err (!%p1210_p9)
}
  0x1f   : > { %1156 = dma.hbm_to_vmem [thread:$0]  (!%p1372_p13), %s99_s26, 1024, %s101_s28, %s88_s30  }
  0x20   : > { %p106_p2 = pnand %p1107_p0, %p105_p1 }
  0x21   : > { %s1393_s16 = sand.u32 (!%p106_p2), 1, %s1287_s7  }
  0x22   : > { %109 = sbr.rel (%p106_p2) target bundleno = 655 (0x28f), region = 24  ;;  %s1108_s20 = sshll.u32 (!%p106_p2), %s1393_s16, 6 }
  0x23   : > { %s112_s21 = scalar_lea.sflag (!%p106_p2), [#allocation3], %s1393_s16  ;;  %s115_s22 = scalar_lea.vmem (!%p106_p2), [#allocation2], %s1108_s20 }
  0x27   : > { %1274 = dma.done.wait (%p1350_p6), %s112_s21, 1024  }
  0x28   : > { %1276 = vsyncadd (%p1350_p6), %s112_s21, 4294966272  ;;  %v1403_v0 = vld [vmem:[%s115_s22 + $0x8] sm:$0xff]  ;;  %v1405_v1 = vld [vmem:[%s115_s22] sm:$0xff]  ;;  %vm557_vm0 = vcmask 27648   ;;  %vm613_vm1 = vcmask 1043456   ;;  %vm609_vm6 = vcmask 31744  }
  0x29   : > { %153 = vst [vmem:[#allocation1 + $0x10] ss:$2 sm:$0xff] %v1403_v0  ;;  %v1408_v2 = vld [vmem:[%s115_s22 + $0x18] sm:$0xff]  ;;  %v1411_v3 = vld [vmem:[%s115_s22 + $0x10] sm:$0xff]  ;;  %v1415_v4 = vld [vmem:[%s115_s22 + $0x28] sm:$0xff]  ;;  %s1478_s17 = scalar_lea.vmem [#allocation5], %s1108_s20 }
  0x2a   : > { %151 = vst [vmem:[#allocation1] ss:$2 sm:$0xff] %v1405_v1  ;;  %v1417_v5 = vld [vmem:[%s115_s22 + $0x20] sm:$0xff]  ;;  %v1420_v9 = vld [vmem:[%s115_s22 + $0x38] sm:$0xff]  ;;  %v1423_v13 = vld [vmem:[%s115_s22 + $0x30] sm:$0xff]  ;;  %s1148_s23 = sshll.u32 %s1328_s10, 6 }
  0x2b   : > { %157 = vst [vmem:[#allocation1 + $0x30] ss:$2 sm:$0xff] %v1408_v2  ;;  %s1026_s26 = scalar_lea.hbm %s1530_s1, %s1148_s23  ;;  %s1028_s27 = sshll.u32 %s1478_s17, 4  ;;  %s1029_s27 = int_to_ptr.vmem [resolvable:$true] %s1028_s27 }
  0x2c   : > { %155 = vst [vmem:[#allocation1 + $0x20] ss:$2 sm:$0xff] %v1411_v3  ;;  %s1030_s28 = sshll.u32 %s1026_s26, 4  ;;  %s1015_s10 = scalar_lea.sflag [#allocation4], %s1393_s16  ;;  %s1031_s28 = int_to_ptr.hbm [resolvable:$true] %s1030_s28 }
  0x2d   : > { %s1243_s29 = sshra.s32 %s1031_s28, 4  ;;  %s1249_s4 = scalar_lea.hbm %s1530_s1, 128  ;;  %s1244_s29 = int_to_ptr.hbm [resolvable:$true] %s1243_s29 }
  0x2e   : > { %s1245_s30 = scalar_lea.hbm %s1244_s29, 64  ;;  %p1250_p0 = scmp.lt.s32.totalorder %s1244_s29, %s1530_s1 }
  0x2f   : > { %p1246_p6 = scmp.ne.s32.totalorder %s1244_s29, %s1245_s30  ;;  %p1251_p1 = scmp.lt.s32.totalorder %s1249_s4, %s1245_s30 }
  0x30   : > { %v160_v6 = vld.sshfl [vmem:[#allocation1 + $0x10] sm:$0xff pattern:$0x75316420]  ;;  %v161_v7 = vld.sshfl [vmem:[#allocation1 + $0x18] sm:$0xff pattern:$0x75316420] }
  0x31   : > { %167 = vst [vmem:[#allocation1 + $0x10] ss:$2 sm:$0xff] %v1415_v4  ;;  %v158_v8 = vld.sshfl [vmem:[#allocation1] sm:$0xff pattern:$0x75316420]  ;;  %p1247_p9 = pnand %p1246_p6, %p1357_p11  ;;  %p1252_p3 = por %p1251_p1, %p1250_p0 }
  0x32   : > { %v159_v10 = vld.sshfl [vmem:[#allocation1 + $0x8] sm:$0xff pattern:$0x75316420]  ;;  %v164_v11 = vld.sshfl [vmem:[#allocation1 + $0x30] sm:$0xff pattern:$0x75316420] }
  0x33   : > { %166 = vst [vmem:[#allocation1] ss:$2 sm:$0xff] %v1417_v5  ;;  %v165_v12 = vld.sshfl [vmem:[#allocation1 + $0x38] sm:$0xff pattern:$0x75316420]  ;;  %p1248_p13 = pneg %p1247_p9 }
  0x34   : > { %169 = vst [vmem:[#allocation1 + $0x30] ss:$2 sm:$0xff] %v1420_v9  ;;  %v162_v14 = vld.sshfl [vmem:[#allocation1 + $0x20] sm:$0xff pattern:$0x75316420] }
  0x35   : > { %v163_v15 = vld.sshfl [vmem:[#allocation1 + $0x28] sm:$0xff pattern:$0x75316420]  ;;  %p1253_p4 = pnand %p1252_p3, %p1248_p13 }
  0x36   : > { %168 = vst [vmem:[#allocation1 + $0x20] ss:$2 sm:$0xff] %v1423_v13 }
  0x38   : > { %v172_v16 = vld.sshfl [vmem:[#allocation1 + $0x10] sm:$0xff pattern:$0x75316420]  ;;  %v173_v17 = vld.sshfl [vmem:[#allocation1 + $0x18] sm:$0xff pattern:$0x75316420] }
  0x39   : > { %196 = vst [vmem:[#allocation1 + $0x10] ss:$2 sm:$0xff] %v1403_v0 }
  0x3a   : > { %v170_v18 = vld.sshfl [vmem:[#allocation1] sm:$0xff pattern:$0x75316420]  ;;  %v171_v19 = vld.sshfl [vmem:[#allocation1 + $0x8] sm:$0xff pattern:$0x75316420] }
  0x3b   : > { %194 = vst [vmem:[#allocation1] ss:$2 sm:$0xff] %v1405_v1  ;;  %v176_v20 = vld.sshfl [vmem:[#allocation1 + $0x30] sm:$0xff pattern:$0x75316420] }
  0x3c   : > { %v177_v21 = vld.sshfl [vmem:[#allocation1 + $0x38] sm:$0xff pattern:$0x75316420] }
  0x3d   : > { %200 = vst [vmem:[#allocation1 + $0x30] ss:$2 sm:$0xff] %v1408_v2  ;;  %v174_v22 = vld.sshfl [vmem:[#allocation1 + $0x20] sm:$0xff pattern:$0x75316420] }
  0x3e   : > { %v175_v23 = vld.sshfl [vmem:[#allocation1 + $0x28] sm:$0xff pattern:$0x75316420] }
  0x3f   : > { %198 = vst [vmem:[#allocation1 + $0x20] ss:$2 sm:$0xff] %v1411_v3 }
  0x40   : > { %v203_v24 = vld.sshfl [vmem:[#allocation1 + $0x10] sm:$0xff pattern:$0x75316420]  ;;  %v204_v25 = vld.sshfl [vmem:[#allocation1 + $0x18] sm:$0xff pattern:$0x75316420] }
  0x41   : > { %292 = vmatpush.xpose.msra.mxu2 %v203_v24  ;;  %210 = vst [vmem:[#allocation1 + $0x10] ss:$2 sm:$0xff] %v1415_v4  ;;  %312 = vmatpush.xpose.msra.mxu3 %v204_v25 }
  0x42   : > { %v201_v26 = vld.sshfl [vmem:[#allocation1] sm:$0xff pattern:$0x75316420]  ;;  %v202_v27 = vld.sshfl [vmem:[#allocation1 + $0x8] sm:$0xff pattern:$0x75316420] }
  0x43   : > { %252 = vmatpush.xpose.msra.mxu0 %v201_v26  ;;  %209 = vst [vmem:[#allocation1] ss:$2 sm:$0xff] %v1417_v5  ;;  %272 = vmatpush.xpose.msra.mxu1 %v202_v27 }
  0x44   : > { %293 = vmatmul.f32.vlgmr.msra.gmra.mxu2 %v160_v6  ;;  %v207_v28 = vld.sshfl [vmem:[#allocation1 + $0x30] sm:$0xff pattern:$0x75316420]  ;;  %313 = vmatmul.f32.vlgmr.msra.gmra.mxu3 %v161_v7  ;;  %v208_v29 = vld.sshfl [vmem:[#allocation1 + $0x38] sm:$0xff pattern:$0x75316420] }
  0x45   : > { %372 = vmatpush.xpose.msrb.mxu2 %v207_v28  ;;  %212 = vst [vmem:[#allocation1 + $0x30] ss:$2 sm:$0xff] %v1420_v9  ;;  %392 = vmatpush.xpose.msrb.mxu3 %v208_v29 }
  0x46   : > { %253 = vmatmul.f32.vlgmr.msra.gmra.mxu0 %v158_v8  ;;  %273 = vmatmul.f32.vlgmr.msra.gmra.mxu1 %v159_v10  ;;  %v205_v30 = vld.sshfl [vmem:[#allocation1 + $0x20] sm:$0xff pattern:$0x75316420]  ;;  %v206_v31 = vld.sshfl [vmem:[#allocation1 + $0x28] sm:$0xff pattern:$0x75316420] }
  0x47   : > { %332 = vmatpush.xpose.msrb.mxu0 %v205_v30  ;;  %211 = vst [vmem:[#allocation1 + $0x20] ss:$2 sm:$0xff] %v1423_v13  ;;  %352 = vmatpush.xpose.msrb.mxu1 %v206_v31 }
  0x48   : > { %v215_v32 = vld.sshfl [vmem:[#allocation1 + $0x10] sm:$0xff pattern:$0x75316420]  ;;  %v216_v33 = vld.sshfl [vmem:[#allocation1 + $0x18] sm:$0xff pattern:$0x75316420] }
  0x49   : > { %452 = vmatpush.xpose.msra.mxu2 %v215_v32  ;;  %472 = vmatpush.xpose.msra.mxu3 %v216_v33  ;;  %584 = vst [vmem:[#allocation1 + $0x10] ss:$2 sm:$0xff] %v1403_v0 }
  0x4a   : > { %v213_v34 = vld.sshfl [vmem:[#allocation1] sm:$0xff pattern:$0x75316420]  ;;  %v214_v35 = vld.sshfl [vmem:[#allocation1 + $0x8] sm:$0xff pattern:$0x75316420] }
  0x4b   : > { %412 = vmatpush.xpose.msra.mxu0 %v213_v34  ;;  %432 = vmatpush.xpose.msra.mxu1 %v214_v35  ;;  %582 = vst [vmem:[#allocation1] ss:$2 sm:$0xff] %v1405_v1 }
  0x4c   : > { %373 = vmatmul.f32.vlgmr.msrb.gmra.mxu2 %v164_v11  ;;  %393 = vmatmul.f32.vlgmr.msrb.gmra.mxu3 %v165_v12  ;;  %v219_v36 = vld.sshfl [vmem:[#allocation1 + $0x30] sm:$0xff pattern:$0x75316420]  ;;  %v220_v37 = vld.sshfl [vmem:[#allocation1 + $0x38] sm:$0xff pattern:$0x75316420] }
  0x4d   : > { %532 = vmatpush.xpose.msrb.mxu2 %v219_v36  ;;  %552 = vmatpush.xpose.msrb.mxu3 %v220_v37  ;;  %588 = vst [vmem:[#allocation1 + $0x30] ss:$2 sm:$0xff] %v1408_v2 }
  0x4e   : > { %333 = vmatmul.f32.vlgmr.msrb.gmra.mxu0 %v162_v14  ;;  %353 = vmatmul.f32.vlgmr.msrb.gmra.mxu1 %v163_v15  ;;  %v217_v38 = vld.sshfl [vmem:[#allocation1 + $0x20] sm:$0xff pattern:$0x75316420]  ;;  %v218_v39 = vld.sshfl [vmem:[#allocation1 + $0x28] sm:$0xff pattern:$0x75316420] }
  0x4f   : > { %492 = vmatpush.xpose.msrb.mxu0 %v217_v38  ;;  %512 = vmatpush.xpose.msrb.mxu1 %v218_v39  ;;  %586 = vst [vmem:[#allocation1 + $0x20] ss:$2 sm:$0xff] %v1411_v3 }
  0x54   : > { %453 = vmatmul.f32.vlgmr.msra.gmra.mxu2 %v172_v16  ;;  %473 = vmatmul.f32.vlgmr.msra.gmra.mxu3 %v173_v17  ;;  %v592_v17 = vld.sshfl [vmem:[#allocation1 + $0x18] sm:$0xff pattern:$0x75316420] }
  0x55   : > { %1116 = vmatpush.msk.msra.mxu3 %vm613_vm1, %v592_v17 }
  0x56   : > { %413 = vmatmul.f32.vlgmr.msra.gmra.mxu0 %v170_v18  ;;  %433 = vmatmul.f32.vlgmr.msra.gmra.mxu1 %v171_v19  ;;  %v591_v18 = vld.sshfl [vmem:[#allocation1 + $0x10] sm:$0xff pattern:$0x75316420]  ;;  %v590_v19 = vld.sshfl [vmem:[#allocation1 + $0x8] sm:$0xff pattern:$0x75316420] }
  0x57   : > { %1114 = vmatpush.msk.msra.mxu2 %vm613_vm1, %v591_v18  ;;  %598 = vst [vmem:[#allocation1 + $0x10] ss:$2 sm:$0xff] %v1415_v4  ;;  %1112 = vmatpush.msk.msra.mxu1 %vm613_vm1, %v590_v19  ;;  %v593_v24 = vld.sshfl [vmem:[#allocation1 + $0x20] sm:$0xff pattern:$0x75316420] }
  0x5c   : > { %533 = vmatmul.f32.vlgmr.msrb.gmra.mxu2 %v176_v20  ;;  %553 = vmatmul.f32.vlgmr.msrb.gmra.mxu3 %v177_v21  ;;  %v589_v20 = vld.sshfl [vmem:[#allocation1] sm:$0xff pattern:$0x75316420]  ;;  %v596_v21 = vld.sshfl [vmem:[#allocation1 + $0x38] sm:$0xff pattern:$0x75316420] }
  0x5d   : > { %1110 = vmatpush.msk.msra.mxu0 %vm613_vm1, %v589_v20  ;;  %597 = vst [vmem:[#allocation1] ss:$2 sm:$0xff] %v1417_v5  ;;  %1124 = vmatpush.msk.msrb.mxu3 %vm613_vm1, %v596_v21 }
  0x5e   : > { %493 = vmatmul.f32.vlgmr.msrb.gmra.mxu0 %v174_v22  ;;  %513 = vmatmul.f32.vlgmr.msrb.gmra.mxu1 %v175_v23  ;;  %v595_v22 = vld.sshfl [vmem:[#allocation1 + $0x30] sm:$0xff pattern:$0x75316420]  ;;  %v594_v23 = vld.sshfl [vmem:[#allocation1 + $0x28] sm:$0xff pattern:$0x75316420] }
  0x5f   : > { %1122 = vmatpush.msk.msrb.mxu2 %vm613_vm1, %v595_v22  ;;  %600 = vst [vmem:[#allocation1 + $0x30] ss:$2 sm:$0xff] %v1420_v9  ;;  %1120 = vmatpush.msk.msrb.mxu1 %vm613_vm1, %v594_v23  ;;  %v604_v34 = vld.sshfl [vmem:[#allocation1 + $0x18] sm:$0xff pattern:$0x75316420] }
  0x60   : > { %1118 = vmatpush.msk.msrb.mxu0 %vm613_vm1, %v593_v24  ;;  %599 = vst [vmem:[#allocation1 + $0x20] ss:$2 sm:$0xff] %v1423_v13  ;;  %v603_v13 = vld.sshfl [vmem:[#allocation1 + $0x10] sm:$0xff pattern:$0x75316420] }
  0x64   : > { %v602_v35 = vld.sshfl [vmem:[#allocation1 + $0x8] sm:$0xff pattern:$0x75316420]  ;;  %v601_v36 = vld.sshfl [vmem:[#allocation1] sm:$0xff pattern:$0x75316420] }
  0x66   : > { %v608_v37 = vld.sshfl [vmem:[#allocation1 + $0x38] sm:$0xff pattern:$0x75316420]  ;;  %v607_v38 = vld.sshfl [vmem:[#allocation1 + $0x30] sm:$0xff pattern:$0x75316420] }
  0x67   : > { %v606_v39 = vld.sshfl [vmem:[#allocation1 + $0x28] sm:$0xff pattern:$0x75316420] }
  0xc3   : > { %v254_v40 = vpop.f32.mrf.mxu0  ;;  %v274_v41 = vpop.f32.mrf.mxu1 }
  0xc4   : > { %v275_v42 = vadd.f32 %v274_v41, %v254_v40  ;;  %v605_v40 = vld.sshfl [vmem:[#allocation1 + $0x20] sm:$0xff pattern:$0x75316420] }
  0xc7   : > { %v294_v43 = vpop.f32.mrf.mxu2  ;;  %v314_v44 = vpop.f32.mrf.mxu3 }
  0xc8   : > { %v295_v45 = vadd.f32 %v294_v43, %v275_v42 }
  0xca   : > { %v315_v46 = vadd.f32 %v314_v44, %v295_v45 }
  0xcb   : > { %v334_v47 = vpop.f32.mrf.mxu0  ;;  %v354_v48 = vpop.f32.mrf.mxu1 }
  0xcc   : > { %v335_v49 = vadd.f32 %v334_v47, %v315_v46 }
  0xce   : > { %v355_v50 = vadd.f32 %v354_v48, %v335_v49 }
  0xcf   : > { %v374_v51 = vpop.f32.mrf.mxu2  ;;  %v394_v52 = vpop.f32.mrf.mxu3 }
  0xd0   : > { %v375_v53 = vadd.f32 %v374_v51, %v355_v50 }
  0xd2   : > { %v395_v54 = vadd.f32 %v394_v52, %v375_v53 }
  0xd3   : > { %v414_v55 = vpop.f32.mrf.mxu0  ;;  %v434_v56 = vpop.f32.mrf.mxu1 }
  0xd4   : > { %v415_v57 = vadd.f32 %v414_v55, %v395_v54 }
  0xd6   : > { %v435_v58 = vadd.f32 %v434_v56, %v415_v57 }
  0xd7   : > { %v454_v59 = vpop.f32.mrf.mxu2  ;;  %v474_v60 = vpop.f32.mrf.mxu3 }
  0xd8   : > { %v455_v61 = vadd.f32 %v454_v59, %v435_v58 }
  0xda   : > { %v475_v62 = vadd.f32 %v474_v60, %v455_v61 }
  0xdb   : > { %v494_v63 = vpop.f32.mrf.mxu0  ;;  %v514_v0 = vpop.f32.mrf.mxu1 }
  0xdc   : > { %v495_v1 = vadd.f32 %v494_v63, %v475_v62 }
  0xde   : > { %v515_v2 = vadd.f32 %v514_v0, %v495_v1 }
  0xdf   : > { %v534_v3 = vpop.f32.mrf.mxu2  ;;  %v554_v6 = vpop.f32.mrf.mxu3 }
  0xe0   : > { %v535_v7 = vadd.f32 %v534_v3, %v515_v2 }
  0xe2   : > { %v555_v8 = vadd.f32 %v554_v6, %v535_v7 }
  0xe4   : > { %v558_v10 = vsel %vm557_vm0, %v555_v8, -inf }
  0xe5   : > { %559 = vmax.xlane.f32.xlu0 %v558_v10 }
 0x158   : > { %v560_v11 = vpop.xlane.xlu0 %559 }
 0x159   : > { %v561_v12 = vsub.f32 %v555_v8, %v560_v11 }
 0x15b   : > { %v562_v14 = vmul.f32 1.442695, %v561_v12 }
 0x15d   : > { %1195 = vpow2.f32 %v562_v14 }
 0x163   : > { %v1196_v15 = vpop.eup %1195 }
 0x164   : > { %v564_v16 = vsel %vm557_vm0, %v1196_v15, 0.0 }
 0x165   : > { %565 = vadd.xlane.f32.xlu0 %v564_v16 }
 0x1d8   : > { %v566_v4 = vpop.xlane.xlu0 %565 }
 0x1d9   : > { %1197 = vrcp.f32 %v566_v4  ;;  %v578_v27 = vand.u32 2147483648, %v566_v4  ;;  %v576_v29 = vand.u32 2147483647, %v566_v4  ;;  %vm572_vm3 = vweird.f32 %v566_v4 }
 0x1db   : > { %v579_v9 = vor.u32 1.1754944e-38, %v578_v27  ;;  %vm577_vm5 = vcmp.eq.f32.partialorder %v576_v29, 8.507059e+37 }
 0x1df   : > { %v1198_v25 = vpop.eup %1197 }
 0x1e0   : > { %v568_v5 = vmul.f32 %v1198_v25, %v566_v4  ;;  %vm573_vm2 = vweird.f32 %v1198_v25 }
 0x1e1   : > { %vm574_vm4 = vmor %vm572_vm3, %vm573_vm2 }
 0x1e2   : > { %v569_v26 = vsub.f32 1.0, %v568_v5 }
 0x1e4   : > { %v570_v28 = vmul.f32 %v1198_v25, %v569_v26 }
 0x1e6   : > { %v571_v30 = vadd.f32 %v1198_v25, %v570_v28 }
 0x1e8   : > { %v575_v31 = vsel %vm574_vm4, %v1198_v25, %v571_v30 }
 0x1e9   : > { %v580_v32 = vsel %vm577_vm5, %v579_v9, %v575_v31 }
 0x1ea   : > { %v581_v33 = vmul.f32 %v1196_v15, %v580_v32 }
 0x1ec   : > { %1111 = vmatmul.msk.f32.vlgmr.msra.gmra.mxu0 %vm609_vm6, %v581_v33  ;;  %1113 = vmatmul.msk.f32.vlgmr.msra.gmra.mxu1 %vm609_vm6, %v581_v33 }
 0x1ed   : > { %1115 = vmatmul.msk.f32.vlgmr.msra.gmra.mxu2 %vm609_vm6, %v581_v33  ;;  %1117 = vmatmul.msk.f32.vlgmr.msra.gmra.mxu3 %vm609_vm6, %v581_v33 }
 0x1ee   : > { %1132 = vmatpush.msk.msra.mxu3 %vm613_vm1, %v604_v34  ;;  %1130 = vmatpush.msk.msra.mxu2 %vm613_vm1, %v603_v13 }
 0x1ef   : > { %1128 = vmatpush.msk.msra.mxu1 %vm613_vm1, %v602_v35  ;;  %1126 = vmatpush.msk.msra.mxu0 %vm613_vm1, %v601_v36 }
 0x1f4   : > { %1119 = vmatmul.msk.f32.vlgmr.msrb.gmra.mxu0 %vm609_vm6, %v581_v33  ;;  %1121 = vmatmul.msk.f32.vlgmr.msrb.gmra.mxu1 %vm609_vm6, %v581_v33 }
 0x1f5   : > { %1123 = vmatmul.msk.f32.vlgmr.msrb.gmra.mxu2 %vm609_vm6, %v581_v33  ;;  %1125 = vmatmul.msk.f32.vlgmr.msrb.gmra.mxu3 %vm609_vm6, %v581_v33 }
 0x1f6   : > { %1140 = vmatpush.msk.msrb.mxu3 %vm613_vm1, %v608_v37  ;;  %1138 = vmatpush.msk.msrb.mxu2 %vm613_vm1, %v607_v38 }
 0x1f7   : > { %1136 = vmatpush.msk.msrb.mxu1 %vm613_vm1, %v606_v39  ;;  %1134 = vmatpush.msk.msrb.mxu0 %vm613_vm1, %v605_v40 }
 0x1fc   : > { %1127 = vmatmul.msk.f32.vlgmr.msra.gmra.mxu0 %vm609_vm6, %v581_v33  ;;  %1129 = vmatmul.msk.f32.vlgmr.msra.gmra.mxu1 %vm609_vm6, %v581_v33 }
 0x1fd   : > { %1131 = vmatmul.msk.f32.vlgmr.msra.gmra.mxu2 %vm609_vm6, %v581_v33  ;;  %1133 = vmatmul.msk.f32.vlgmr.msra.gmra.mxu3 %vm609_vm6, %v581_v33 }
 0x204   : > { %1135 = vmatmul.msk.f32.vlgmr.msrb.gmra.mxu0 %vm609_vm6, %v581_v33  ;;  %1137 = vmatmul.msk.f32.vlgmr.msrb.gmra.mxu1 %vm609_vm6, %v581_v33 }
 0x205   : > { %1139 = vmatmul.msk.f32.vlgmr.msrb.gmra.mxu2 %vm609_vm6, %v581_v33  ;;  %1141 = vmatmul.msk.f32.vlgmr.msrb.gmra.mxu3 %vm609_vm6, %v581_v33 }
 0x269   : > { %v663_v41 = vpop.f32.mrf.mxu0  ;;  %v683_v42 = vpop.f32.mrf.mxu1 }
 0x26a   : > { %v982_v43 = vrot.slane %v683_v42, 4 }
 0x26c   : > { %v990_v44 = vsel %vm613_vm1, %v663_v41, %v982_v43 }
 0x26d   : > { %1006 = vst [vmem:[%s1478_s17] sm:$0xff] %v990_v44 }
 0x270   : > { %v703_v45 = vpop.f32.mrf.mxu2  ;;  %v723_v46 = vpop.f32.mrf.mxu3 }
 0x271   : > { %v983_v47 = vrot.slane %v723_v46, 4  ;;  %v743_v48 = vpop.f32.mrf.mxu0  ;;  %v763_v49 = vpop.f32.mrf.mxu1 }
 0x272   : > { %v984_v50 = vrot.slane %v763_v49, 4 }
 0x273   : > { %v991_v51 = vsel %vm613_vm1, %v703_v45, %v983_v47 }
 0x274   : > { %1007 = vst [vmem:[%s1478_s17 + $0x8] sm:$0xff] %v991_v51  ;;  %v992_v52 = vsel %vm613_vm1, %v743_v48, %v984_v50 }
 0x275   : > { %1008 = vst [vmem:[%s1478_s17 + $0x10] sm:$0xff] %v992_v52 }
 0x278   : > { %v783_v53 = vpop.f32.mrf.mxu2  ;;  %v803_v54 = vpop.f32.mrf.mxu3 }
 0x279   : > { %v985_v55 = vrot.slane %v803_v54, 4  ;;  %v823_v56 = vpop.f32.mrf.mxu0  ;;  %v843_v57 = vpop.f32.mrf.mxu1 }
 0x27a   : > { %v986_v58 = vrot.slane %v843_v57, 4 }
 0x27b   : > { %v993_v59 = vsel %vm613_vm1, %v783_v53, %v985_v55 }
 0x27c   : > { %1009 = vst [vmem:[%s1478_s17 + $0x18] sm:$0xff] %v993_v59  ;;  %v994_v60 = vsel %vm613_vm1, %v823_v56, %v986_v58 }
 0x27d   : > { %1010 = vst [vmem:[%s1478_s17 + $0x20] sm:$0xff] %v994_v60 }
 0x280   : > { %v863_v61 = vpop.f32.mrf.mxu2  ;;  %v883_v62 = vpop.f32.mrf.mxu3 }
 0x281   : > { %v987_v63 = vrot.slane %v883_v62, 4  ;;  %v923_v0 = vpop.f32.mrf.mxu1  ;;  %v903_v3 = vpop.f32.mrf.mxu0 }
 0x282   : > { %v988_v1 = vrot.slane %v923_v0, 4 }
 0x283   : > { %v995_v2 = vsel %vm613_vm1, %v863_v61, %v987_v63 }
 0x284   : > { %1011 = vst [vmem:[%s1478_s17 + $0x28] sm:$0xff] %v995_v2  ;;  %v996_v6 = vsel %vm613_vm1, %v903_v3, %v988_v1 }
 0x285   : > { %1012 = vst [vmem:[%s1478_s17 + $0x30] sm:$0xff] %v996_v6 }
 0x288   : > { %v963_v7 = vpop.f32.mrf.mxu3  ;;  %v943_v10 = vpop.f32.mrf.mxu2 }
 0x289   : > { %v989_v8 = vrot.slane %v963_v7, 4 }
 0x28b   : > { %v997_v11 = vsel %vm613_vm1, %v943_v10, %v989_v8 }
 0x28c   : > { %1013 = vst [vmem:[%s1478_s17 + $0x38] sm:$0xff] %v997_v11 }
 0x28d   : > { %1256 = shalt.err (!%p1253_p4)
}
 0x28e   : > { %1151 = dma.vmem_to_hbm [thread:$0]  (%p1357_p11), %s1029_s27, 1024, %s1031_s28, %s1015_s10  }
 0x28f PF: > { %s1042_s13 = sand.u32 1, %s1283_s6   ;;  %p1536_p7 = scmp.ge.s32.totalorder %s1295_s9, 2 }
 0x290   : > { %s1043_s14 = scalar_lea.sflag [#allocation4], %s1042_s13 }
 0x291   : > { %p1158_p5 = pnand %p1536_p7, %p1361_p12 }
 0x293   : > { %p1159_p8 = pneg %p1158_p5 }
 0x295   : > { %1278 = dma.done.wait (%p1159_p8), %s1043_s14, 1024  }
 0x296   : > { %1280 = vsyncadd (%p1159_p8), %s1043_s14, 4294966272  ;;  %p14_p10 = scmp.ge.s32.totalorder %s1332_s12, 4   ;;  %s1537_s6 = smov %s1287_s7 }
 0x297   : > { %s1538_s7 = smov %s1291_s8  ;;  %s1539_s8 = smov %s1344_s15 }
 0x298   : > { %s1540_s9 = smov %s1332_s12  ;;  %16 = sbr.rel (!%p14_p10) target bundleno = 5 (0x5), region = 78 }
 0x29d   :  { %1049 = vsyncpa [#allocation3], 1 }
 0x29e   :  { %1051 = vsyncpa [#allocation3 + $0x1], 1 }
 0x29f   :  { %1052 = vsyncpa [#allocation4], 1 }
 0x2a0   :  { %1054 = vsyncpa [#allocation4 + $0x1], 1 }

</bundles_post_ra>
